<compile_context>
chip_gen: v7x
topology: tpu7x:2x2x1
jax: 0.10.0
libtpu: 0.0.40
codegen_flags: <defaults>
</compile_context>

<pallas_src>
import jax
import jax.numpy as jnp
from jax.experimental import pallas as pl
from jax.experimental.pallas import tpu as pltpu


def _make_normalize_kernel(scale, shift):
    """Builds an elementwise y = scale*x + shift kernel with baked-in constants."""
    def kernel(x_ref, o_ref):
        # Upcast to f32 for the affine (no-op for f32 inputs; negligible for
        # sub-32-bit inputs since this kernel is HBM-bound), store in out dtype.
        x = x_ref[...].astype(jnp.float32)
        o_ref[...] = (x * scale + shift).astype(o_ref.dtype)
    return kernel


_LANE_CANDIDATES = (1024, 512, 256, 128)
_MIN_SPLIT_BYTES = 1 << 20  # only force a >=2-step grid (2 TCs on v7x) above this


def _normalize_2d(x2d, scale, shift, *, target_block_bytes, vmem_limit_bytes,
                  in_place):
    """Runs the Pallas affine kernel on a lane-dense (rows, lanes) array."""
    rows, lanes = x2d.shape
    dtype = x2d.dtype
    itemsize = jnp.dtype(dtype).itemsize
    n = rows * lanes

    # Sublane packing: 8 rows per vreg-sublane-tile for 32-bit, 16 for 16-bit,
    # 32 for 8-bit.  Row tiles that are multiples of this keep stores unmasked.
    sub = max(8, (8 * 4) // itemsize)

    # Largest sublane-aligned row tile fitting target_block_bytes.
    row_cap = max(sub, (target_block_bytes // (lanes * itemsize)) // sub * sub)

    total_bytes = n * itemsize
    if rows > row_cap:
        row_tile = row_cap
    elif total_bytes >= _MIN_SPLIT_BYTES and rows >= 2 * sub:
        # Fits in one block, but split so v7x's two TensorCores both get work.
        half = pl.cdiv(rows, 2)
        row_tile = min(rows, pl.cdiv(half, sub) * sub)
    else:
        # Small tensor (or too few rows to split): single full-extent block
        # (full-dim blocks are always legal, even if rows < 8).
        row_tile = rows

    grid = (pl.cdiv(rows, row_tile),)

    return pl.pallas_call(
        _make_normalize_kernel(scale, shift),
        out_shape=jax.ShapeDtypeStruct((rows, lanes), dtype),
        grid_spec=pltpu.PrefetchScalarGridSpec(
            num_scalar_prefetch=0,
            grid=grid,
            in_specs=[pl.BlockSpec((row_tile, lanes), lambda i: (i, 0))],
            out_specs=pl.BlockSpec((row_tile, lanes), lambda i: (i, 0)),
        ),
        compiler_params=pltpu.CompilerParams(
            dimension_semantics=("parallel",),
            vmem_limit_bytes=vmem_limit_bytes),
        cost_estimate=pl.CostEstimate(
            flops=2 * n, transcendentals=0, bytes_accessed=2 * n * itemsize),
        input_output_aliases=({0: 0} if in_place else {}),
    )(x2d)


def normalize(x, min_val=-1.0, max_val=1.0, *,
              target_block_bytes=8 * 1024 * 1024,
              vmem_limit_bytes=48 * 1024 * 1024,
              in_place=False):
    """Applies y = 2*(x - 0.5*(min+max))/(max-min) elementwise via Pallas."""
    if max_val == min_val:
        raise ValueError("normalize: max_val must differ from min_val")

    # min/max are Python constructor constants in the PyTorch module, so they
    # are baked into the kernel closure (no SMEM scalar operands needed).
    scale = 2.0 / (max_val - min_val)
    shift = -(min_val + max_val) / (max_val - min_val)

    orig_shape = x.shape
    dtype = x.dtype
    n = x.size
    if n == 0:
        return x

    x_flat = jnp.reshape(x, (-1,))

    # Common path: a lane width (multiple of 128) divides n exactly -> no
    # wrapper-side padding or trailing copies at all.
    for cand in _LANE_CANDIDATES:
        if n % cand == 0:
            out2d = _normalize_2d(
                jnp.reshape(x_flat, (n // cand, cand)), scale, shift,
                target_block_bytes=target_block_bytes,
                vmem_limit_bytes=vmem_limit_bytes, in_place=in_place)
            return jnp.reshape(out2d, orig_shape)

    # Awkward size: Pallas on the 128-aligned bulk prefix, tiny (<128 elem)
    # tail with plain jnp (avoids the old full-tensor pad + slice round trips).
    bulk = n - (n % 128)
    tail = x_flat[bulk:]
    tail_out = (tail.astype(jnp.float32) * scale + shift).astype(dtype)
    if bulk == 0:
        return jnp.reshape(tail_out, orig_shape)
    lanes = next(c for c in _LANE_CANDIDATES if bulk % c == 0)
    head_out = _normalize_2d(
        jnp.reshape(x_flat[:bulk], (bulk // lanes, lanes)), scale, shift,
        target_block_bytes=target_block_bytes,
        vmem_limit_bytes=vmem_limit_bytes, in_place=in_place)
    out_flat = jnp.concatenate([jnp.reshape(head_out, (-1,)), tail_out])
    return jnp.reshape(out_flat, orig_shape)


if __name__ == "__main__":
    key = jax.random.PRNGKey(0)
    k0, k1, k2 = jax.random.split(key, 3)

    ok = True

    # NCHW input: batch=2, channels=4, spatial=16x16 (common lane-aligned path).
    x = jax.random.uniform(k0, (2, 4, 16, 16), dtype=jnp.float32)
    for (mn, mx) in [(-1.0, 1.0), (0.0, 1.0)]:   # Normalize() defaults + non-trivial
        y = jax.block_until_ready(normalize(x, mn, mx))
        y_ref = 2.0 * (x - 0.5 * (mn + mx)) / (mx - mn)
        ok = ok and (y.shape == x.shape) and (y.dtype == x.dtype)
        ok = ok and bool(jnp.max(jnp.abs(y - y_ref)) < 1e-6)

    # Awkward size (not a multiple of 128): bulk-Pallas + jnp tail path.
    x_odd = jax.random.uniform(k1, (2, 3, 65), dtype=jnp.float32)
    y_odd = jax.block_until_ready(normalize(x_odd, 0.0, 1.0))
    y_odd_ref = 2.0 * (x_odd - 0.5) / 1.0
    ok = ok and (y_odd.shape == x_odd.shape) and (y_odd.dtype == x_odd.dtype)
    ok = ok and bool(jnp.max(jnp.abs(y_odd - y_odd_ref)) < 1e-6)

    # Larger tensor (>= 1 MiB): exercises the >=2-step parallel grid path.
    x_big = jax.random.uniform(k2, (512, 1024), dtype=jnp.float32)
    y_big = jax.block_until_ready(normalize(x_big, -1.0, 1.0))
    y_big_ref = 2.0 * (x_big - 0.0) / 2.0
    ok = ok and bool(jnp.max(jnp.abs(y_big - y_big_ref)) < 1e-6)

    assert ok
    print("KERNEL_OK")
</pallas_src>

<mosaic_0001>
module attributes {stable_mosaic.version = 11 : i64} {
  func.func @kernel(%arg0: i32, %arg1: memref<2x1024xf32, #tpu.memory_space<vmem>>, %arg2: memref<2x1024xf32, #tpu.memory_space<vmem>>) attributes {dimension_semantics = [#tpu.dimension_semantics<parallel>], iteration_bounds = array<i64: 1>, scalar_prefetch = 0 : i64, scratch_operands = 0 : i64, tpu.core_type = #tpu.core_type<tc>, window_params = [{transform_indices = @transform_0, window_bounds = array<i64: 2, 1024>}, {transform_indices = @transform_1, window_bounds = array<i64: 2, 1024>}]} {
    %c0 = arith.constant 0 : index
    %c0_0 = arith.constant 0 : index
    %0 = vector.load %arg1[%c0, %c0_0] : memref<2x1024xf32, #tpu.memory_space<vmem>>, vector<2x1024xf32>
    %cst = arith.constant 1.000000e+00 : f32
    %1 = vector.broadcast %cst : f32 to vector<2x1024xf32>
    %2 = arith.mulf %0, %1 : vector<2x1024xf32>
    %cst_1 = arith.constant -0.000000e+00 : f32
    %3 = vector.broadcast %cst_1 : f32 to vector<2x1024xf32>
    %4 = arith.addf %2, %3 : vector<2x1024xf32>
    %c0_2 = arith.constant 0 : index
    %c0_3 = arith.constant 0 : index
    %5 = vector.load %arg2[%c0_2, %c0_3] : memref<2x1024xf32, #tpu.memory_space<vmem>>, vector<2x1024xf32>
    tpu.vector_store %arg2[%c0_2, %c0_3], %4 {strides = array<i32>} : memref<2x1024xf32, #tpu.memory_space<vmem>>, vector<2x1024xf32>,
    return
  }
  func.func @transform_0(%arg0: i32) -> (i32, i32) {
    %c0_i32 = arith.constant 0 : i32
    %c0_i32_0 = arith.constant 0 : i32
    return %arg0, %c0_i32 : i32, i32
  }
  func.func @transform_1(%arg0: i32) -> (i32, i32) {
    %c0_i32 = arith.constant 0 : i32
    %c0_i32_0 = arith.constant 0 : i32
    return %arg0, %c0_i32 : i32, i32
  }
}

</mosaic_0001>

<bundles_post_ra>
// kernel: tpu_custom_call.1
= control target key start
LH: loop header
LB: loop body
LE: loop exit
PB: predicated region body
PF: predicated region fallthrough
CT: control target
= control target key end

     0   :  { %6 = vsyncpa [#allocation3], 0  ;;  %s126_s0 = inlined_call_operand.hbm [shape: f32[2,1024], index: 0, kind: input, shape index: {}]   ;;  %s127_s1 = inlined_call_operand.hbm [shape: f32[2,1024], index: 1, kind: output, shape index: {}]  }
   0x1   :  { %7 = vsyncpa [#allocation4], 0  ;;  %s90_s6 = smov [#allocation2]   ;;  %s42_s10 = scalar_lea.hbm %s126_s0, 256 }
   0x2   :  { %s14_s7 = sshll.u32 %s90_s6, 4  ;;  %p43_p0 = scmp.ne.s32.totalorder %s126_s0, %s42_s10  ;;  %s15_s7 = int_to_ptr.vmem [resolvable:$true] %s14_s7 }
   0x3   :  { %p46_p1 = scmp.lt.u32.totalorder %s42_s10, %s126_s0 }
   0x5   :  { %p48_p2 = pnand %p46_p1, %p43_p0 }
   0x7   :  { %51 = shalt.err (!%p48_p2)
}
   0x8   :  { %s52_s15 = scalar_lea.vmem %s15_s7, 256  ;;  %p57_p4 = scmp.lt.s32.totalorder %s15_s7, %s15_s7 }
   0x9   :  { %p53_p3 = scmp.ne.s32.totalorder %s15_s7, %s52_s15  ;;  %p58_p5 = scmp.lt.s32.totalorder %s52_s15, %s52_s15 }
   0xb   :  { %p59_p6 = por %p58_p5, %p57_p4 }
   0xd   :  { %p60_p7 = pnand %p59_p6, %p53_p3 }
   0xf   :  { %63 = shalt.err (!%p60_p7)
}
  0x10   :  { %17 = dma.hbm_to_vmem [thread:$0]  %s126_s0, 256, %s15_s7, [#allocation3]  }
  0x11   :  { %86 = dma.done.wait [#allocation3], 256  }
  0x12   :  { %87 = vsyncadd [#allocation3], 4294967040  ;;  %s91_s18 = smov [#allocation5]   ;;  %v21_v0 = vld [vmem:[#allocation2] sm:$0xff]  ;;  %v22_v1 = vld [vmem:[#allocation2 + $0x8] sm:$0xff] }
  0x13   :  { %s31_s19 = sshll.u32 %s91_s18, 4  ;;  %23 = vst [vmem:[#allocation5] sm:$0xff] %v21_v0  ;;  %24 = vst [vmem:[#allocation5 + $0x8] sm:$0xff] %v22_v1  ;;  %s32_s19 = int_to_ptr.vmem [resolvable:$true] %s31_s19 }
  0x14   :  { %s64_s20 = scalar_lea.vmem %s32_s19, 256  ;;  %p69_p9 = scmp.lt.s32.totalorder %s32_s19, %s32_s19 }
  0x15   :  { %p65_p8 = scmp.ne.s32.totalorder %s32_s19, %s64_s20  ;;  %p70_p10 = scmp.lt.s32.totalorder %s64_s20, %s64_s20 }
  0x17   :  { %p71_p11 = por %p70_p10, %p69_p9 }
  0x19   :  { %p72_p12 = pnand %p71_p11, %p65_p8 }
  0x1b   :  { %75 = shalt.err (!%p72_p12)
}
  0x1c   :  { %s76_s0 = scalar_lea.hbm %s127_s1, 256 }
  0x1d   :  { %p77_p13 = scmp.ne.s32.totalorder %s127_s1, %s76_s0  ;;  %p80_p0 = scmp.lt.u32.totalorder %s76_s0, %s127_s1 }
  0x1f   :  { %p82_p1 = pnand %p80_p0, %p77_p13 }
  0x21   :  { %85 = shalt.err (!%p82_p1)
}
  0x22   :  { %34 = dma.vmem_to_hbm [thread:$0]  %s32_s19, 256, %s127_s1, [#allocation4]  }
  0x23   :  { %88 = dma.done.wait [#allocation4], 256  }
  0x24   :  { %89 = vsyncadd [#allocation4], 4294967040 }
  0x25   :  { %38 = vsyncpa [#allocation3], 1 }
  0x26   :  { %39 = vsyncpa [#allocation4], 1 }

</bundles_post_ra>
